<compile_context>
chip_gen: v5e
topology: v5e:2x2
jax: 0.10.0
libtpu: 0.0.40
codegen_flags: <defaults>
</compile_context>

<pallas_src>
import math
from dataclasses import dataclass

import numpy as np
import jax
import jax.numpy as jnp
from jax.experimental import pallas as pl
from jax.experimental.pallas import tpu as pltpu

D_TOK = 64      # packed latent channel dim (16 channels * 2 * 2 patch)
HID = 128       # hidden width of the synthetic denoiser MLP
_LANE = 128


def _round_up(x, m):
    return -(-x // m) * m


def _block_diag2(w):
    """diag(w, w): lets two 64-wide tokens share one 128-wide lane-dense row."""
    z = jnp.zeros_like(w)
    top = jnp.concatenate([w, z], axis=1)
    bot = jnp.concatenate([z, w], axis=1)
    return jnp.concatenate([top, bot], axis=0)


def _pick_row_tile(rows):
    # Whole slab in one row block when small (per-grid-step overhead dominates);
    # split into exactly two parallel row blocks at real Flux sizes so both
    # TensorCores of a v7x chip get work (harmless on v5e/v6e).
    if rows >= 1024 and rows % 16 == 0:
        return rows // 2
    return rows


# ----------------------------------------------------------------------------------
# Pallas kernels
# ----------------------------------------------------------------------------------
def _fused_euler_kernel(dts_ref, img_ref, b1s_ref, w1_ref, w2_ref, b2_ref,
                        out_ref, traj_ref):
    """All Euler steps fused: state <- state + dt[s] * MLP(state; step-folded bias).

    Grid = (row_blocks, num_steps).  `out_ref` (block index constant over the step axis)
    is the resident step-carried state; `traj_ref` records the pre-step state for each
    timestep (KV-Edit's inversion feature cache).
    """
    s = pl.program_id(1)

    @pl.when(s == 0)
    def _():
        out_ref[...] = img_ref[...]

    cur = out_ref[...]
    # TODO(synk): trajectory could be emitted as bf16 to halve the dominant HBM write
    # traffic; kept f32 because it seeds the denoise pass.
    traj_ref[0] = cur                                   # pre-step state for this timestep

    # Per-step bias already folded into b1s (b1 + bias_s @ W1), so feed state directly.
    h = jnp.tanh(jnp.dot(cur.astype(jnp.bfloat16), w1_ref[...],
                         preferred_element_type=jnp.float32) + b1s_ref[0])
    # NOTE: tanh goes through the single EUP unit; once step overhead is gone this is the
    # likely binding slot, but it is part of the stand-in denoiser definition so kept.
    pred = jnp.dot(h.astype(jnp.bfloat16), w2_ref[...],
                   preferred_element_type=jnp.float32) + b2_ref[...]

    out_ref[...] = cur + dts_ref[s] * pred


def _blend_kernel(z_ref, m_ref, x_ref, o_ref):
    """z*(1-m) + x*m elementwise on a lane-dense slab (single whole-array block)."""
    m = m_ref[...]
    o_ref[...] = z_ref[...] * (1.0 - m) + x_ref[...] * m


# ----------------------------------------------------------------------------------
# Pallas wrappers
# ----------------------------------------------------------------------------------
@jax.jit
def _fused_euler_denoise(params, img, t_currs, dts, guidance):
    """Run the full Euler schedule on [B, L, D] tokens in one pallas_call.

    Returns (final_img [B,L,D], trajectory [S,B,L,D] of pre-step states).
    """
    bs, L, d = img.shape
    S = t_currs.shape[0]
    M = bs * L

    # Lane-dense repack: two 64-wide tokens per 128-wide row (pure view reshape) with
    # block-diagonal weights so the math is unchanged.  Fallback keeps D=64 layout.
    repack = (M % 2 == 0)
    if repack:
        rows, width, hid2 = M // 2, 2 * d, 2 * HID
        x2 = img.reshape(rows, width).astype(jnp.float32)
        w1 = _block_diag2(params['w1']).astype(jnp.bfloat16)
        w2 = _block_diag2(params['w2']).astype(jnp.bfloat16)
        b2 = jnp.concatenate([params['b2'], params['b2']], axis=-1)
    else:
        rows, width, hid2 = M, d, HID
        x2 = img.reshape(rows, width).astype(jnp.float32)
        w1 = params['w1'].astype(jnp.bfloat16)
        w2 = params['w2'].astype(jnp.bfloat16)
        b2 = params['b2']

    # Fold the per-step bias (t*temb + g*gemb) into the first-layer bias: one [S,1,2H]
    # f32 table, indexed by the step axis inside the kernel.
    bias = (t_currs.astype(jnp.float32)[:, None, None] * params['temb'][None]
            + guidance * params['gemb'][None])                       # [S, 1, d]
    b1s = params['b1'][None] + jnp.matmul(bias, params['w1'])        # [S, 1, HID]
    if repack:
        b1s = jnp.concatenate([b1s, b1s], axis=-1)                   # [S, 1, 2*HID]

    tm = _pick_row_tile(rows)

    out, traj = pl.pallas_call(
        _fused_euler_kernel,
        out_shape=(jax.ShapeDtypeStruct((rows, width), jnp.float32),
                   jax.ShapeDtypeStruct((S, rows, width), jnp.float32)),
        grid=(rows // tm, S),
        in_specs=[
            pl.BlockSpec(memory_space=pltpu.MemorySpace.SMEM),        # dt per step
            pl.BlockSpec((tm, width), lambda i, s: (i, 0)),           # initial tokens
            pl.BlockSpec((1, 1, hid2), lambda i, s: (s, 0, 0)),       # folded per-step b1
            pl.BlockSpec((width, hid2), lambda i, s: (0, 0)),         # W1 (bf16, block-diag)
            pl.BlockSpec((hid2, width), lambda i, s: (0, 0)),         # W2 (bf16, block-diag)
            pl.BlockSpec((1, width), lambda i, s: (0, 0)),            # b2
        ],
        out_specs=(pl.BlockSpec((tm, width), lambda i, s: (i, 0)),    # state (resident over s)
                   pl.BlockSpec((1, tm, width), lambda i, s: (s, i, 0))),  # trajectory
        compiler_params=pltpu.CompilerParams(
            dimension_semantics=("parallel", "arbitrary"),
            vmem_limit_bytes=48 * 1024 * 1024),
    )(dts.astype(jnp.float32), x2, b1s, w1, w2, b2)

    final = out.reshape(bs, L, d)
    traj = traj.reshape(S, bs, L, d)
    return final, traj


@jax.jit
def pallas_masked_blend(z_sel, m_sel, x):
    """z*(1-m) + x*m on [B, Lsel, D] — copy-free lane-dense Pallas elementwise kernel."""
    shape = z_sel.shape
    N = int(np.prod(shape))
    if N % _LANE == 0:
        rows, width = N // _LANE, _LANE          # lane-dense view, pure reshape
    else:
        width = shape[-1]
        rows = N // width

    def view(a):
        return a.astype(jnp.float32).reshape(rows, width)

    out = pl.pallas_call(
        _blend_kernel,
        out_shape=jax.ShapeDtypeStruct((rows, width), jnp.float32),
        in_specs=[pl.BlockSpec(memory_space=pltpu.MemorySpace.VMEM)] * 3,
        out_specs=pl.BlockSpec(memory_space=pltpu.MemorySpace.VMEM),
    )(view(z_sel), view(m_sel), view(x))
    return out.reshape(shape).astype(z_sel.dtype)


# ----------------------------------------------------------------------------------
# Glue (schedule, packing, mask prep) — plain numpy / JAX
# ----------------------------------------------------------------------------------
def _time_shift(mu, sigma, t):
    if t <= 0.0:
        return 0.0
    return math.exp(mu) / (math.exp(mu) + (1.0 / t - 1.0) ** sigma)


def _lin(x, x1=256, y1=0.5, x2=4096, y2=1.15):
    m = (y2 - y1) / (x2 - x1)
    b = y1 - m * x1
    return m * x + b


def get_schedule(num_steps, image_seq_len, base_shift=0.5, max_shift=1.15, shift=True):
    ts = [1.0 - i / num_steps for i in range(num_steps + 1)]    # linspace(1, 0, n+1)
    if shift:
        mu = _lin(image_seq_len, y1=base_shift, y2=max_shift)
        ts = [_time_shift(mu, 1.0, t) for t in ts]
    return ts


def _bilinear_resize_nchw_np(a, out_h, out_w):
    """Matches torch.nn.functional.interpolate(mode='bilinear', align_corners=False)."""
    b, c, in_h, in_w = a.shape

    def coords(out_sz, in_sz):
        src = (np.arange(out_sz, dtype=np.float64) + 0.5) * (in_sz / out_sz) - 0.5
        src = np.clip(src, 0.0, in_sz - 1)
        i0 = np.floor(src).astype(np.int64)
        i1 = np.minimum(i0 + 1, in_sz - 1)
        wgt = (src - i0).astype(np.float32)
        return i0, i1, wgt

    y0, y1, wy = coords(out_h, in_h)
    x0, x1, wx = coords(out_w, in_w)
    top = (a[:, :, y0, :] * (1.0 - wy)[None, None, :, None]
           + a[:, :, y1, :] * wy[None, None, :, None])
    out = top[:, :, :, x0] * (1.0 - wx) + top[:, :, :, x1] * wx
    return out.astype(np.float32)


def prep_token_mask(mask_np, h, w):
    """F.interpolate(bilinear) -> threshold -> repeat(16) -> rearrange to [B, hw/4, 64]."""
    b = mask_np.shape[0]
    m = _bilinear_resize_nchw_np(np.asarray(mask_np, dtype=np.float32), h, w)
    m = np.where(m > 0, 1.0, m).astype(np.float32)
    m = np.tile(m, (1, 16, 1, 1))                               # b 16 h w
    h2, w2 = h // 2, w // 2
    m = m.reshape(b, 16, h2, 2, w2, 2)
    m = m.transpose(0, 2, 4, 1, 3, 5)                           # b h2 w2 c ph pw
    return m.reshape(b, h2 * w2, 64)


def unpack(x, height, width):
    b = x.shape[0]
    h2 = math.ceil(height / 16)
    w2 = math.ceil(width / 16)
    c = x.shape[2] // 4
    x = x.reshape(b, h2, w2, c, 2, 2)
    x = x.transpose(0, 3, 1, 4, 2, 5)
    return x.reshape(b, c, h2 * 2, w2 * 2)


def init_flux_kv_params(key, d=D_TOK, hid=HID):
    ks = jax.random.split(key, 6)
    return {
        'w1': jax.random.normal(ks[0], (d, hid), jnp.float32) / math.sqrt(d),
        'b1': jax.random.normal(ks[1], (1, hid), jnp.float32) * 0.01,
        'w2': jax.random.normal(ks[2], (hid, d), jnp.float32) / math.sqrt(hid),
        'b2': jax.random.normal(ks[3], (1, d), jnp.float32) * 0.01,
        'temb': jax.random.normal(ks[4], (1, d), jnp.float32) * 0.1,
        'gemb': jax.random.normal(ks[5], (1, d), jnp.float32) * 0.01,
    }


def denoise_kv(params, img, img_ids=None, txt=None, txt_ids=None, vec=None,
               timesteps=None, guidance=4.0, inverse=False, info=None):
    # TODO(synk): the real Flux_kv is a full MM-DiT transformer with per-block KV caching;
    # a synthetic per-token MLP (single fused Pallas kernel over all Euler steps) stands in —
    # txt/vec/attention_mask/attention_scale are threaded through but unused by the stand-in.
    ts = list(timesteps)
    if inverse:
        ts = ts[::-1]
    t_currs = jnp.asarray(np.asarray(ts[:-1], dtype=np.float32))
    dts = jnp.asarray(np.asarray(ts[1:], dtype=np.float32)
                      - np.asarray(ts[:-1], dtype=np.float32))
    final, traj = _fused_euler_denoise(params, img, t_currs, dts, float(guidance))
    for i, (t_curr, t_prev) in enumerate(zip(ts[:-1], ts[1:])):
        info['t'] = t_prev if inverse else t_curr
        if inverse:
            info['feature'][str(info['t']) + '_img'] = traj[i]
    return final, info


# ----------------------------------------------------------------------------------
# Module
# ----------------------------------------------------------------------------------
@dataclass
class SamplingOptions:
    height: int
    width: int
    denoise_num_steps: int
    skip_step: int
    inversion_guidance: float
    denoise_guidance: float
    re_init: bool
    attn_mask: bool
    attn_scale: float


class OnlyFlux:
    def __init__(self, name='flux-dev', key=None):
        self.name = name
        # Deterministic synthetic parameters standing in for load_flow_model(...).
        self.model_params = init_flux_kv_params(
            key if key is not None else jax.random.PRNGKey(0))

    def create_attention_mask(self, seq_len, mask_indices, text_len=512):
        mask_indices = np.asarray(mask_indices)
        idx = np.arange(seq_len)
        is_text = idx < text_len
        is_mask_tok = np.zeros(seq_len, dtype=bool)
        is_mask_tok[mask_indices + text_len] = True
        is_bg = (idx >= text_len) & ~is_mask_tok
        A = np.zeros((seq_len, seq_len), dtype=bool)
        A |= is_text[:, None]                               # text rows -> all True
        A |= is_text[:, None] & is_text[None, :]
        A |= is_text[:, None] & is_bg[None, :]
        A |= is_mask_tok[:, None] & is_text[None, :]
        A |= is_mask_tok[:, None] & is_mask_tok[None, :]
        A |= is_bg[:, None] & is_text[None, :]
        A |= is_bg[:, None] & is_bg[None, :]
        return jnp.asarray(A)[None]

    def create_attention_scale(self, seq_len, mask_indices, text_len=512, scale=0):
        mask_indices = np.asarray(mask_indices)
        is_mask_tok = np.zeros(seq_len, dtype=bool)
        is_mask_tok[mask_indices + text_len] = True
        bg = np.arange(text_len, seq_len)[~is_mask_tok[text_len:]]
        s = np.zeros((1, seq_len), dtype=np.float32)
        s[0, bg] = scale
        return jnp.asarray(s, dtype=jnp.bfloat16)[None]


class FluxKVEdit(OnlyFlux):
    def forward(self, inp, inp_ref, mask, opts):
        z0, zt, info = self.inverse(dict(inp), mask, opts)
        z0_r, zt_r, info_r = self.inverse(dict(inp_ref), mask, opts)
        z0 = self.denoise(z0, z0_r, zt_r, dict(inp_ref), mask, opts, info)
        return z0

    def inverse(self, inp, mask, opts):
        info = {'feature': {}}
        bs, L, d = inp['img'].shape
        h = opts.height // 8
        w = opts.width // 8
        if opts.attn_mask:
            tok_mask = prep_token_mask(np.asarray(mask), h, w)
            bool_mask = tok_mask.sum(axis=2) > 0.5
            mask_indices = np.nonzero(bool_mask)[1]
            assert not (~bool_mask).all(), 'mask is all false'
            assert not bool_mask.all(), 'mask is all true'
            info['attention_mask'] = self.create_attention_mask(L + 512, mask_indices)
        ts = get_schedule(opts.denoise_num_steps, inp['img'].shape[1],
                          shift=self.name != 'flux-schnell')
        ts = ts[opts.skip_step:]
        z0 = inp['img']
        info['inverse'] = True
        zt, info = denoise_kv(self.model_params, **inp, timesteps=ts,
                              guidance=opts.inversion_guidance, inverse=True, info=info)
        return z0, zt, info

    def denoise(self, z0, z0_r, zt_r, inp_target, mask, opts, info):
        h = opts.height // 8
        w = opts.width // 8
        L = h * w // 4
        tok_mask_np = prep_token_mask(np.asarray(mask), h, w)
        tok_mask = jnp.asarray(tok_mask_np)
        info['mask'] = tok_mask
        bool_mask = tok_mask_np.sum(axis=2) > 0.5
        mask_indices = np.nonzero(bool_mask)[1]
        info['mask_indices'] = mask_indices
        ts = get_schedule(opts.denoise_num_steps, inp_target['img'].shape[1],
                          shift=self.name != 'flux-schnell')
        ts = ts[opts.skip_step:]
        midx = jnp.asarray(mask_indices)
        if opts.re_init:
            noise = jax.random.normal(jax.random.PRNGKey(42), zt_r.shape, zt_r.dtype)
            t0 = ts[0]
            zt_noise = z0_r * (1 - t0) + noise * t0
            inp_target['img'] = zt_noise[:, midx, :]
        else:
            # NOTE: matches the original spec — feature comes from the *target* image's
            # inversion info (the `info` argument), not info_r.
            img_name = str(info['t']) + '_' + 'img'
            zt_r = info['feature'][img_name]
            inp_target['img'] = zt_r[:, midx, :]
        if opts.attn_scale != 0 and (~bool_mask).any():
            attention_scale = self.create_attention_scale(L + 512, mask_indices,
                                                          scale=opts.attn_scale)
        else:
            attention_scale = None
        info['attention_scale'] = attention_scale
        info['inverse'] = False
        x, _ = denoise_kv(self.model_params, **inp_target, timesteps=ts,
                          guidance=opts.denoise_guidance, inverse=False, info=info)
        # masked blend of original tokens with denoised tokens (lane-dense Pallas kernel)
        z0_sel = z0[:, midx, :]
        m_sel = tok_mask[:, midx, :]
        blended = pallas_masked_blend(z0_sel, m_sel, x)
        z0 = z0.at[:, midx, :].set(blended.astype(z0.dtype))
        z0 = unpack(z0.astype(jnp.float32), opts.height, opts.width)
        return z0


# ----------------------------------------------------------------------------------
if __name__ == "__main__":
    key = jax.random.PRNGKey(0)
    k_model, k_img, k_img_ref, k_txt, k_vec = jax.random.split(key, 5)

    opts = SamplingOptions(height=64, width=64, denoise_num_steps=4, skip_step=0,
                           inversion_guidance=1.5, denoise_guidance=5.5,
                           re_init=False, attn_mask=True, attn_scale=1.0)
    h, w = opts.height // 8, opts.width // 8
    L = h * w // 4   # 16 packed latent tokens

    def make_inp(kimg):
        return {
            'img': jax.random.normal(kimg, (1, L, D_TOK), jnp.float32),
            'img_ids': jnp.zeros((1, L, 3), jnp.float32),
            'txt': jax.random.normal(k_txt, (1, 512, 32), jnp.float32),
            'txt_ids': jnp.zeros((1, 512, 3), jnp.float32),
            'vec': jax.random.normal(k_vec, (1, 32), jnp.float32),
        }

    inp = make_inp(k_img)
    inp_ref = make_inp(k_img_ref)

    mask_np = np.zeros((1, 1, opts.height, opts.width), np.float32)
    mask_np[:, :, 16:48, 16:48] = 1.0        # edit region (image-resolution mask, NCHW)
    mask = jnp.asarray(mask_np)

    model = FluxKVEdit(name='flux-dev', key=k_model)
    out = model.forward(inp, inp_ref, mask, opts)
    out = jax.block_until_ready(out)
    assert out.shape == (1, 16, h, w) and out.dtype == jnp.float32
    assert bool(jnp.all(jnp.isfinite(out)))
    print("KERNEL_OK")
</pallas_src>

<mosaic_0001>
module attributes {stable_mosaic.version = 11 : i64} {
  func.func @_fused_euler_kernel(%arg0: i32, %arg1: i32, %arg2: memref<4xf32, #tpu.memory_space<smem>>, %arg3: memref<8x128xf32, #tpu.memory_space<vmem>>, %arg4: memref<1x1x256xf32, #tpu.memory_space<vmem>>, %arg5: memref<128x256xbf16, #tpu.memory_space<vmem>>, %arg6: memref<256x128xbf16, #tpu.memory_space<vmem>>, %arg7: memref<1x128xf32, #tpu.memory_space<vmem>>, %arg8: memref<8x128xf32, #tpu.memory_space<vmem>>, %arg9: memref<1x8x128xf32, #tpu.memory_space<vmem>>) attributes {dimension_semantics = [#tpu.dimension_semantics<parallel>, #tpu.dimension_semantics<arbitrary>], iteration_bounds = array<i64: 1, 4>, scalar_prefetch = 0 : i64, scratch_operands = 0 : i64, tpu.core_type = #tpu.core_type<tc>, window_params = [{transform_indices = @transform_0, window_bounds = array<i64: 4>}, {transform_indices = @transform_1, window_bounds = array<i64: 8, 128>}, {transform_indices = @transform_2, window_bounds = array<i64: 1, 1, 256>}, {pipeline_mode = #tpu.pipeline_mode<synchronous>, transform_indices = @transform_3, window_bounds = array<i64: 128, 256>}, {pipeline_mode = #tpu.pipeline_mode<synchronous>, transform_indices = @transform_4, window_bounds = array<i64: 256, 128>}, {pipeline_mode = #tpu.pipeline_mode<synchronous>, transform_indices = @transform_5, window_bounds = array<i64: 1, 128>}, {transform_indices = @transform_6, window_bounds = array<i64: 8, 128>}, {transform_indices = @transform_7, window_bounds = array<i64: 1, 8, 128>}]} {
    %c0_i32 = arith.constant 0 : i32
    %0 = arith.cmpi eq, %arg1, %c0_i32 : i32
    %1 = arith.extui %0 : i1 to i32
    %c0_i32_0 = arith.constant 0 : i32
    %2 = arith.cmpi ne, %1, %c0_i32_0 : i32
    scf.if %2 {
      %c0_17 = arith.constant 0 : index
      %c0_18 = arith.constant 0 : index
      %27 = vector.load %arg3[%c0_17, %c0_18] : memref<8x128xf32, #tpu.memory_space<vmem>>, vector<8x128xf32>
      %c0_19 = arith.constant 0 : index
      %c0_20 = arith.constant 0 : index
      %28 = vector.load %arg8[%c0_19, %c0_20] : memref<8x128xf32, #tpu.memory_space<vmem>>, vector<8x128xf32>
      tpu.vector_store %arg8[%c0_19, %c0_20], %27 {strides = array<i32>} : memref<8x128xf32, #tpu.memory_space<vmem>>, vector<8x128xf32>,
    } else {
    }
    %c0 = arith.constant 0 : index
    %c0_1 = arith.constant 0 : index
    %3 = vector.load %arg8[%c0, %c0_1] : memref<8x128xf32, #tpu.memory_space<vmem>>, vector<8x128xf32>
    %c0_2 = arith.constant 0 : index
    %c0_3 = arith.constant 0 : index
    %c0_4 = arith.constant 0 : index
    %4 = vector.load %arg9[%c0_2, %c0_3, %c0_4] : memref<1x8x128xf32, #tpu.memory_space<vmem>>, vector<1x8x128xf32>
    %5 = vector.shape_cast %4 : vector<1x8x128xf32> to vector<8x128xf32>
    %6 = vector.shape_cast %3 : vector<8x128xf32> to vector<1x8x128xf32>
    tpu.vector_store %arg9[%c0_2, %c0_3, %c0_4], %6 {strides = array<i32>} : memref<1x8x128xf32, #tpu.memory_space<vmem>>, vector<1x8x128xf32>,
    %7 = arith.truncf %3 : vector<8x128xf32> to vector<8x128xbf16>
    %c0_5 = arith.constant 0 : index
    %c0_6 = arith.constant 0 : index
    %8 = vector.load %arg5[%c0_5, %c0_6] : memref<128x256xbf16, #tpu.memory_space<vmem>>, vector<128x256xbf16>
    %cst = arith.constant dense<0.000000e+00> : vector<8x256xf32>
    %9 = tpu.matmul %7, %8, %cst {dimension_numbers = #tpu.dot_dimension_numbers<[1], [0], [0], [1], [0, 0, 1, 1], [], []>} : vector<8x128xbf16>, vector<128x256xbf16>, vector<8x256xf32> -> vector<8x256xf32>
    %c0_7 = arith.constant 0 : index
    %c0_8 = arith.constant 0 : index
    %c0_9 = arith.constant 0 : index
    %10 = vector.load %arg4[%c0_7, %c0_8, %c0_9] : memref<1x1x256xf32, #tpu.memory_space<vmem>>, vector<1x1x256xf32>
    %11 = vector.shape_cast %10 : vector<1x1x256xf32> to vector<1x256xf32>
    %12 = vector.broadcast %11 : vector<1x256xf32> to vector<8x256xf32>
    %13 = arith.addf %9, %12 : vector<8x256xf32>
    %14 = math.tanh %13 : vector<8x256xf32>
    %15 = arith.truncf %14 : vector<8x256xf32> to vector<8x256xbf16>
    %c0_10 = arith.constant 0 : index
    %c0_11 = arith.constant 0 : index
    %16 = vector.load %arg6[%c0_10, %c0_11] : memref<256x128xbf16, #tpu.memory_space<vmem>>, vector<256x128xbf16>
    %cst_12 = arith.constant dense<0.000000e+00> : vector<8x128xf32>
    %17 = tpu.matmul %15, %16, %cst_12 {dimension_numbers = #tpu.dot_dimension_numbers<[1], [0], [0], [1], [0, 0, 1, 1], [], []>} : vector<8x256xbf16>, vector<256x128xbf16>, vector<8x128xf32> -> vector<8x128xf32>
    %c0_13 = arith.constant 0 : index
    %c0_14 = arith.constant 0 : index
    %18 = vector.load %arg7[%c0_13, %c0_14] : memref<1x128xf32, #tpu.memory_space<vmem>>, vector<1x128xf32>
    %19 = vector.broadcast %18 : vector<1x128xf32> to vector<8x128xf32>
    %20 = arith.addf %17, %19 : vector<8x128xf32>
    %21 = arith.index_cast %arg1 : i32 to index
    %22 = memref.load %arg2[%21] : memref<4xf32, #tpu.memory_space<smem>>
    %23 = vector.broadcast %22 : f32 to vector<8x128xf32>
    %24 = arith.mulf %23, %20 : vector<8x128xf32>
    %25 = arith.addf %3, %24 : vector<8x128xf32>
    %c0_15 = arith.constant 0 : index
    %c0_16 = arith.constant 0 : index
    %26 = vector.load %arg8[%c0_15, %c0_16] : memref<8x128xf32, #tpu.memory_space<vmem>>, vector<8x128xf32>
    tpu.vector_store %arg8[%c0_15, %c0_16], %25 {strides = array<i32>} : memref<8x128xf32, #tpu.memory_space<vmem>>, vector<8x128xf32>,
    return
  }
  func.func @transform_0(%arg0: i32, %arg1: i32) -> i32 {
    %c0_i32 = arith.constant 0 : i32
    %c0_i32_0 = arith.constant 0 : i32
    return %c0_i32 : i32
  }
  func.func @transform_1(%arg0: i32, %arg1: i32) -> (i32, i32) {
    %c0_i32 = arith.constant 0 : i32
    %c0_i32_0 = arith.constant 0 : i32
    return %arg0, %c0_i32 : i32, i32
  }
  func.func @transform_2(%arg0: i32, %arg1: i32) -> (i32, i32, i32) {
    %c0_i32 = arith.constant 0 : i32
    %c0_i32_0 = arith.constant 0 : i32
    %c0_i32_1 = arith.constant 0 : i32
    return %arg1, %c0_i32, %c0_i32_0 : i32, i32, i32
  }
  func.func @transform_3(%arg0: i32, %arg1: i32) -> (i32, i32) {
    %c0_i32 = arith.constant 0 : i32
    %c0_i32_0 = arith.constant 0 : i32
    %c0_i32_1 = arith.constant 0 : i32
    return %c0_i32, %c0_i32_0 : i32, i32
  }
  func.func @transform_4(%arg0: i32, %arg1: i32) -> (i32, i32) {
    %c0_i32 = arith.constant 0 : i32
    %c0_i32_0 = arith.constant 0 : i32
    %c0_i32_1 = arith.constant 0 : i32
    return %c0_i32, %c0_i32_0 : i32, i32
  }
  func.func @transform_5(%arg0: i32, %arg1: i32) -> (i32, i32) {
    %c0_i32 = arith.constant 0 : i32
    %c0_i32_0 = arith.constant 0 : i32
    %c0_i32_1 = arith.constant 0 : i32
    return %c0_i32, %c0_i32_0 : i32, i32
  }
  func.func @transform_6(%arg0: i32, %arg1: i32) -> (i32, i32) {
    %c0_i32 = arith.constant 0 : i32
    %c0_i32_0 = arith.constant 0 : i32
    return %arg0, %c0_i32 : i32, i32
  }
  func.func @transform_7(%arg0: i32, %arg1: i32) -> (i32, i32, i32) {
    %c0_i32 = arith.constant 0 : i32
    %c0_i32_0 = arith.constant 0 : i32
    return %arg1, %arg0, %c0_i32 : i32, i32, i32
  }
}

</mosaic_0001>

<bundles_post_ra>
// kernel: _fused_euler_denoise.1
= control target key start
LH: loop header
LB: loop body
LE: loop exit
PB: predicated region body
PF: predicated region fallthrough
CT: control target
= control target key end

     0   :  { %13 = vsyncpa [#allocation3], 0  ;;  %s1065_s24 = smov 0   ;;  %s1067_s25 = smov 0   ;;  %s1279_s0 = inlined_call_operand.vmem [shape: f32[4], index: 0, kind: input, shape index: {}]   ;;  %s1280_s1 = inlined_call_operand.vmem [shape: f32[8,128], index: 1, kind: input, shape index: {}]   ;;  %s1281_s2 = inlined_call_operand.vmem [shape: f32[4,1,256], index: 2, kind: input, shape index: {}]   ;;  %s1282_s3 = inlined_call_operand.vmem [shape: bf16[128,256], index: 3, kind: input, shape index: {}]   ;;  %s1283_s4 = inlined_call_operand.vmem [shape: bf16[256,128], index: 4, kind: input, shape index: {}]   ;;  %s1284_s5 = inlined_call_operand.vmem [shape: f32[1,128], index: 5, kind: input, shape index: {}]   ;;  %s1285_s6 = inlined_call_operand.vmem [shape: f32[8,128], index: 6, kind: output, shape index: {0}]   ;;  %s1286_s7 = inlined_call_operand.vmem [shape: f32[4,8,128], index: 7, kind: output, shape index: {1}]  }
   0x1   :  { %s1069_s26 = smov 0  }
   0x2 LB: > { %s767_s27 = sadd.s32 4294967295, %s1022_s26   ;;  %s28_s28 = sadd.s32 1, %s1018_s25  ;;  %s1022_s26 = sphi %s1069_s26, %s19_s26   ;;  %s1018_s25 = sphi %s1067_s25, %s1288_s25   ;;  %s1014_s24 = sphi %s1065_s24, %s1287_s24  }
   0x3   : > { %p29_p0 = scmp.ge.s32.totalorder %s28_s28, 4  ;;  %p769_p1 = scmp.ge.s32.totalorder %s1022_s26, 1 }
   0x4   : > { %p226_p2 = scmp.lt.s32.totalorder %s1022_s26, 5  ;;  %p949_p4 = scmp.eq.s32.totalorder %s767_s27, 0 }
   0x5   : > { %s1290_s28 = smov (%p29_p0, %s28_s28), 0  ;;  %s238_s8 = sshll.u32 %s1279_s0, 4  ;;  %s239_s8 = int_to_ptr.vmem [resolvable:$true] %s238_s8 }
   0x6   : > { %p227_p3 = pnand %p769_p1, %p226_p2  ;;  %s1024_s9 = smov [#allocation2]  }
   0x8   : > { %p945_p5 = pneg %p227_p3  ;;  %274 = sbr.rel (%p227_p3) target bundleno = 338 (0x152), region = 44 }
   0xa   : > { %p946_p6 = pnand %p949_p4, %p945_p5 }
   0xc   : > { %948 = dma.vmem_to_smem (!%p946_p6), %s239_s8, 16, %s1024_s9, [#allocation3]  }
   0xd   : > { %1009 = dma.done.wait (%p949_p4), [#allocation3], 16  }
   0xe   : > { %1011 = vsyncadd (%p949_p4), [#allocation3], 4294967280 }
   0xf   : > { %281 = sfence }
  0x10   : > { %p321_p7 = scmp.lt.s32.totalorder %s1014_s24, 3  ;;  %p777_p8 = scmp.ne.s32.totalorder %s1014_s24, 0 }
  0x12   : > { %s322_s10 = scalar_select %p321_p7, %s1014_s24, 3 }
  0x13   : > { %339 = sbr.rel (%p777_p8) target bundleno = 26 (0x1a), region = 52 }
  0x14   : > { %s775_s11 = sshll.u32 %s322_s10, 1  ;;  %s776_s12 = sshll.u32 %s322_s10, 3 }
  0x15   : > { %s1094_s15 = scalar_lea.vmem %s1281_s2, %s775_s11  ;;  %s1099_s18 = scalar_lea.vmem %s1286_s7, %s776_s12 }
  0x18   : > { %v340_v0 = vld [vmem:[%s1280_s1] sm:$0xff] }
  0x19   : > { %341 = vst [vmem:[%s1285_s6] sm:$0xff] %v340_v0 }
  0x1a PF: > { %v836_v1 = vld [vmem:[%s1282_s3 + $0x70] sm:$0xf]  ;;  %v924_v2 = vld [vmem:[%s1282_s3 + $0x74] sm:$0xf0]  ;;  %v923_v3 = vld [vmem:[%s1282_s3 + $0x74] sm:$0xf] }
  0x1b   : > { %v837_v4 = vor.u32 %v924_v2, %v836_v1  ;;  %v838_v5 = vld [vmem:[%s1282_s3 + $0x78] sm:$0xf0]  ;;  %v828_v6 = vld [vmem:[%s1282_s3 + $0x60] sm:$0xf]  ;;  %v922_v7 = vld [vmem:[%s1282_s3 + $0x64] sm:$0xf0] }
  0x1c   : > { %v841_v8 = vor.u32 %v923_v3, %v838_v5  ;;  %v921_v9 = vld [vmem:[%s1282_s3 + $0x64] sm:$0xf]  ;;  %v830_v10 = vld [vmem:[%s1282_s3 + $0x68] sm:$0xf0]  ;;  %v829_v11 = vor.u32 %v922_v7, %v828_v6  ;;  %v820_v13 = vld [vmem:[%s1282_s3 + $0x50] sm:$0xf] }
  0x1d   : > { %447 = vmatpush.bf16.msra.mxu0 %v837_v4  ;;  %v833_v12 = vor.u32 %v921_v9, %v830_v10  ;;  %v920_v14 = vld [vmem:[%s1282_s3 + $0x54] sm:$0xf0]  ;;  %v919_v15 = vld [vmem:[%s1282_s3 + $0x54] sm:$0xf]  ;;  %v822_v16 = vld [vmem:[%s1282_s3 + $0x58] sm:$0xf0] }
  0x1e   : > { %460 = vmatpush.bf16.msra.mxu1 %v841_v8  ;;  %v821_v17 = vor.u32 %v920_v14, %v820_v13  ;;  %v825_v18 = vor.u32 %v919_v15, %v822_v16  ;;  %v812_v19 = vld [vmem:[%s1282_s3 + $0x40] sm:$0xf]  ;;  %v918_v20 = vld [vmem:[%s1282_s3 + $0x44] sm:$0xf0]  ;;  %v917_v21 = vld [vmem:[%s1282_s3 + $0x44] sm:$0xf] }
  0x1f   : > { %v814_v22 = vld [vmem:[%s1282_s3 + $0x48] sm:$0xf0]  ;;  %v813_v24 = vor.u32 %v918_v20, %v812_v19  ;;  %v932_v25 = vld [vmem:[%s1283_s4 + $0x38] sm:$0xff]  ;;  %v804_v28 = vld [vmem:[%s1282_s3 + $0x30] sm:$0xf]  ;;  %s635_s13 = sld [smem:[#allocation2 + %s1014_s24]] }
  0x20   : > { %v1159_v23 = vld [vmem:[%s1285_s6] sm:$0xff]  ;;  %v940_v26 = vld [vmem:[%s1283_s4 + $0x78] sm:$0xff]  ;;  %v817_v27 = vor.u32 %v917_v21, %v814_v22  ;;  %v915_v30 = vld [vmem:[%s1282_s3 + $0x34] sm:$0xf]  ;;  %609 = vmatpush.bf16.msra.mxu2 %v932_v25 }
  0x21   : > { %448 = vmatpush.bf16.msra.mxu0 %v829_v11  ;;  %343 = vst [vmem:[%s1099_s18] sm:$0xff] %v1159_v23  ;;  %v916_v29 = vld [vmem:[%s1282_s3 + $0x34] sm:$0xf0]  ;;  %v806_v31 = vld [vmem:[%s1282_s3 + $0x38] sm:$0xf0]  ;;  %622 = vmatpush.bf16.msra.mxu3 %v940_v26  ;;  %v931_v32 = vld [vmem:[%s1283_s4 + $0x30] sm:$0xff]  ;;  %v344_v60 = vpack.c.bf16 %v1159_v23, %v1159_v23 }
  0x22   : > { %461 = vmatpush.bf16.msra.mxu1 %v833_v12  ;;  %v939_v33 = vld [vmem:[%s1283_s4 + $0x70] sm:$0xff]  ;;  %v805_v34 = vor.u32 %v916_v29, %v804_v28  ;;  %v809_v35 = vor.u32 %v915_v30, %v806_v31  ;;  %v796_v36 = vld [vmem:[%s1282_s3 + $0x20] sm:$0xf]  ;;  %v914_v37 = vld [vmem:[%s1282_s3 + $0x24] sm:$0xf0] }
  0x23   : > { %v913_v38 = vld [vmem:[%s1282_s3 + $0x24] sm:$0xf]  ;;  %v798_v39 = vld [vmem:[%s1282_s3 + $0x28] sm:$0xf0]  ;;  %v797_v42 = vor.u32 %v914_v37, %v796_v36  ;;  %v788_v44 = vld [vmem:[%s1282_s3 + $0x10] sm:$0xf] }
  0x24   : > { %610 = vmatpush.bf16.msra.mxu2 %v931_v32  ;;  %v930_v40 = vld [vmem:[%s1283_s4 + $0x28] sm:$0xff]  ;;  %v801_v43 = vor.u32 %v913_v38, %v798_v39  ;;  %v912_v45 = vld [vmem:[%s1282_s3 + $0x14] sm:$0xf0]  ;;  %v911_v46 = vld [vmem:[%s1282_s3 + $0x14] sm:$0xf] }
  0x25   : > { %449 = vmatpush.bf16.msra.mxu0 %v821_v17  ;;  %623 = vmatpush.bf16.msra.mxu3 %v939_v33  ;;  %v938_v41 = vld [vmem:[%s1283_s4 + $0x68] sm:$0xff]  ;;  %v790_v47 = vld [vmem:[%s1282_s3 + $0x18] sm:$0xf0]  ;;  %v929_v48 = vld [vmem:[%s1283_s4 + $0x20] sm:$0xff]  ;;  %v789_v50 = vor.u32 %v912_v45, %v788_v44  ;;  %v636_v20 = vstv %s635_s13 }
  0x26   : > { %462 = vmatpush.bf16.msra.mxu1 %v825_v18  ;;  %v937_v49 = vld [vmem:[%s1283_s4 + $0x60] sm:$0xff]  ;;  %v793_v51 = vor.u32 %v911_v46, %v790_v47  ;;  %v910_v53 = vld [vmem:[%s1282_s3 + $0x4] sm:$0xf0]  ;;  %v782_v55 = vld [vmem:[%s1282_s3 + $0x8] sm:$0xf0] }
  0x27   : > { %v780_v52 = vld [vmem:[%s1282_s3] sm:$0xf]  ;;  %v909_v54 = vld [vmem:[%s1282_s3 + $0x4] sm:$0xf]  ;;  %v928_v56 = vld [vmem:[%s1283_s4 + $0x18] sm:$0xff] }
  0x28   : > { %611 = vmatpush.bf16.msra.mxu2 %v930_v40  ;;  %v936_v57 = vld [vmem:[%s1283_s4 + $0x58] sm:$0xff]  ;;  %v781_v58 = vor.u32 %v910_v53, %v780_v52  ;;  %v785_v59 = vor.u32 %v909_v54, %v782_v55  ;;  %v927_v61 = vld [vmem:[%s1283_s4 + $0x10] sm:$0xff]  ;;  %v926_v63 = vld [vmem:[%s1283_s4 + $0x8] sm:$0xff] }
  0x29   : > { %450 = vmatpush.bf16.msra.mxu0 %v813_v24  ;;  %624 = vmatpush.bf16.msra.mxu3 %v938_v41  ;;  %v935_v62 = vld [vmem:[%s1283_s4 + $0x50] sm:$0xff]  ;;  %v934_v0 = vld [vmem:[%s1283_s4 + $0x48] sm:$0xff]  ;;  %v925_v1 = vld [vmem:[%s1283_s4] sm:$0xff] }
  0x2a   : > { %463 = vmatpush.bf16.msra.mxu1 %v817_v27  ;;  %v933_v2 = vld [vmem:[%s1283_s4 + $0x40] sm:$0xff] }
  0x2b   : > { %v361_v3 = vld [vmem:[%s1094_s15] sm:$0x3] }
  0x2c   : > { %612 = vmatpush.bf16.msra.mxu2 %v929_v48  ;;  %v363_v4 = vperm.slane %v361_v3, 0  ;;  %v364_v5 = vperm.slane %v361_v3, 1  ;;  %v976_v16 = vld [vmem:[%s1284_s5] ss:$0 sm:$0xff] }
  0x2d   : > { %451 = vmatpush.bf16.msra.mxu0 %v805_v34  ;;  %625 = vmatpush.bf16.msra.mxu3 %v937_v49 }
  0x2e   : > { %464 = vmatpush.bf16.msra.mxu1 %v809_v35 }
  0x30   : > { %613 = vmatpush.bf16.msra.mxu2 %v928_v56 }
  0x31   : > { %452 = vmatpush.bf16.msra.mxu0 %v797_v42  ;;  %626 = vmatpush.bf16.msra.mxu3 %v936_v57 }
  0x32   : > { %465 = vmatpush.bf16.msra.mxu1 %v801_v43 }
  0x34   : > { %614 = vmatpush.bf16.msra.mxu2 %v927_v61 }
  0x35   : > { %453 = vmatpush.bf16.msra.mxu0 %v789_v50  ;;  %627 = vmatpush.bf16.msra.mxu3 %v935_v62 }
  0x36   : > { %466 = vmatpush.bf16.msra.mxu1 %v793_v51 }
  0x38   : > { %615 = vmatpush.bf16.msra.mxu2 %v926_v63 }
  0x39   : > { %454 = vmatpush.bf16.msra.mxu0 %v781_v58  ;;  %628 = vmatpush.bf16.msra.mxu3 %v934_v0 }
  0x3a   : > { %467 = vmatpush.bf16.msra.mxu1 %v785_v59 }
  0x3c   : > { %455 = vmatmul.bf16.vlgmr.msra.gmra.mxu0 %v344_v60  ;;  %616 = vmatpush.bf16.msra.mxu2 %v925_v1 }
  0x3d   : > { %468 = vmatmul.bf16.vlgmr.msra.gmra.mxu1 %v344_v60  ;;  %629 = vmatpush.bf16.msra.mxu3 %v933_v2 }
  0xb9   : > { %v456_v6 = vpop.f32.mrf.mxu0 }
  0xba   : > { %v457_v7 = vadd.f32 %v456_v6, %v363_v4  ;;  %v469_v8 = vpop.f32.mrf.mxu1 }
  0xbb   : > { %v470_v9 = vadd.f32 %v469_v8, %v364_v5 }
  0xbc   : > { %977 = vtanh.f32 %v457_v7 }
  0xbd   : > { %979 = vtanh.f32 %v470_v9 }
  0xc1   : > { %v458_v10 = vpop.f32.mrf.mxu0 }
  0xc2   : > { %v978_v11 = vpop.eup %977  ;;  %v471_v12 = vpop.f32.mrf.mxu1 }
  0xc3   : > { %v980_v13 = vpop.eup %979  ;;  %v475_v14 = vpack.c.bf16 %v978_v11, %v978_v11 }
  0xc4   : > { %v476_v15 = vpack.c.bf16 %v980_v13, %v980_v13 }
  0xc5   : > { %617 = vmatmul.bf16.vlgmr.msra.gmra.mxu2 %v475_v14 }
  0xc6   : > { %630 = vmatmul.bf16.vlgmr.msra.gmra.mxu3 %v476_v15 }
 0x148   : > { %v618_v17 = vpop.f32.mrf.mxu2 }
 0x149   : > { %v619_v18 = vadd.f32 %v976_v16, %v618_v17  ;;  %v631_v19 = vpop.f32.mrf.mxu3 }
 0x14b   : > { %v632_v21 = vadd.f32 %v631_v19, %v619_v18 }
 0x14d   : > { %v637_v22 = vmul.f32 %v636_v20, %v632_v21 }
 0x14f   : > { %v638_v24 = vadd.f32 %v637_v22, %v1159_v23 }
 0x150   : > { %v620_v25 = vpop.f32.mrf.mxu2 }
 0x151   : > { %639 = vst [vmem:[%s1285_s6] sm:$0xff] %v638_v24  ;;  %v633_v26 = vpop.f32.mrf.mxu3 }
 0x152 PF: > { %s19_s26 = sadd.s32 1, %s1022_s26   ;;  %s1287_s24 = smov %s1018_s25 }
 0x153   : > { %p16_p9 = scmp.ge.s32.totalorder %s19_s26, 6   ;;  %s1288_s25 = smov %s1290_s28 }
 0x155   :  { %18 = sbr.rel (!%p16_p9) target bundleno = 2 (0x2), region = 98 }
 0x15a   :  { %679 = vsyncpa [#allocation3], 1 }
 0x15b   :  { %681 = vsyncpa [#allocation3 + $0x1], 1 }

</bundles_post_ra>
